<compile_context>
chip_gen: v5e
topology: v5e:2x2
jax: 0.10.0
libtpu: 0.0.40
codegen_flags: <defaults>
</compile_context>

<pallas_src>
import math

import jax
import jax.numpy as jnp
from jax.experimental import pallas as pl
from jax.experimental.pallas import tpu as pltpu

_LANE = 128
# Budget for the pipelined tiles (~2 buffers each for input & output).
_TILE_BUDGET_BYTES = 24 * 1024 * 1024
_VMEM_LIMIT_BYTES = 48 * 1024 * 1024


def _softmax_dim0_kernel(x_ref, o_ref):
    # Faithful to MySoftmax.forward (no numerical-stability shift):
    #   x_exp = exp(x); partition = x_exp.sum(0, keepdims=True); x_exp / partition
    x = x_ref[...].astype(jnp.float32)
    x_exp = jnp.exp(x)
    partition = jnp.sum(x_exp, axis=0, keepdims=True)           # (1, tile)
    # One reciprocal per column (EUP) + broadcast multiply (VPU) instead of a
    # full-tile divide; exact reciprocal keeps ~1e-6 parity with the divide.
    inv = pl.reciprocal(partition, approx=False)
    o_ref[...] = (x_exp * inv).astype(o_ref.dtype)


def _pick_col_tile(n: int, itemsize: int) -> int:
    # 2 pipeline buffers each for input & output ~= 4 * n * tile * bytes.
    per_elem = max(itemsize, 4)  # kernel computes in f32
    for tile in (4096, 2048, 1024, 512, 256, 128):
        if 4 * n * tile * per_elem <= _TILE_BUDGET_BYTES:
            return tile
    # TODO(synk): for very large N (a 128-wide tile still won't fit),
    # restructure as a two-pass accumulate-then-normalize kernel with a row
    # grid axis ("arbitrary") feeding a column-resident partition accumulator.
    return 128


def _softmax_dim0_2d(x: jax.Array, col_tile: int | None) -> jax.Array:
    n, d = x.shape
    itemsize = x.dtype.itemsize

    compiler_params = pltpu.CompilerParams(
        dimension_semantics=("parallel",),
        vmem_limit_bytes=_VMEM_LIMIT_BYTES,
    )

    # ---- Small-input fast path: single full-array block, one grid step. ----
    if col_tile is None and 4 * n * d * max(itemsize, 4) <= _TILE_BUDGET_BYTES:
        return pl.pallas_call(
            _softmax_dim0_kernel,
            out_shape=jax.ShapeDtypeStruct((n, d), x.dtype),
            grid_spec=pltpu.PrefetchScalarGridSpec(
                num_scalar_prefetch=0,
                grid=(1,),
                # block == full array dims -> no (8,128) divisibility needed.
                in_specs=[pl.BlockSpec((n, d), lambda j: (0, 0))],
                out_specs=pl.BlockSpec((n, d), lambda j: (0, 0)),
            ),
            compiler_params=compiler_params,
        )(x)

    # ---- Tiled path: tile only the independent column (lane) axis. ---------
    if col_tile is None:
        col_tile = _pick_col_tile(n, itemsize)
    assert col_tile % _LANE == 0, "col_tile must be a multiple of 128"

    num_tiles = pl.cdiv(d, col_tile)
    d_pad = num_tiles * col_tile
    x_in = x if d_pad == d else jnp.pad(x, ((0, 0), (0, d_pad - d)))

    out = pl.pallas_call(
        _softmax_dim0_kernel,
        out_shape=jax.ShapeDtypeStruct((n, d_pad), x.dtype),
        grid_spec=pltpu.PrefetchScalarGridSpec(
            num_scalar_prefetch=0,
            grid=(num_tiles,),
            # Each grid step sees the FULL reduction axis (all N rows) and one
            # lane-dense column tile, so the dim-0 sum is computed in-kernel.
            in_specs=[pl.BlockSpec((n, col_tile), lambda j: (0, j))],
            out_specs=pl.BlockSpec((n, col_tile), lambda j: (0, j)),
        ),
        compiler_params=compiler_params,
    )(x_in)
    return out if d_pad == d else out[:, :d]


def my_softmax(x: jax.Array, *, col_tile: int | None = None) -> jax.Array:
    """Softmax over axis 0 (no max-subtraction), matching MySoftmax.forward.

    Accepts any rank >= 1; trailing dims are flattened into the lane axis
    (pure layout plumbing) and restored afterwards.
    """
    assert x.ndim >= 1, "input must have at least one dimension"
    orig_shape = x.shape
    n = orig_shape[0]
    d = int(math.prod(orig_shape[1:])) if x.ndim > 1 else 1
    x2 = x.reshape(n, d)
    out2 = _softmax_dim0_2d(x2, col_tile)
    return out2.reshape(orig_shape)


def _reference(x):
    x_exp = jnp.exp(x.astype(jnp.float32))
    return (x_exp / jnp.sum(x_exp, axis=0, keepdims=True)).astype(x.dtype)


if __name__ == "__main__":
    key = jax.random.PRNGKey(0)
    k1, k2, k3 = jax.random.split(key, 3)

    # Case 1: small 2-D shape -> single-block fast path.
    x1 = jax.random.normal(k1, (8, 256), dtype=jnp.float32)
    out1 = jax.block_until_ready(my_softmax(x1))
    ref1 = _reference(x1)
    assert out1.shape == x1.shape and out1.dtype == x1.dtype
    assert jnp.allclose(out1, ref1, atol=1e-6, rtol=1e-6)
    assert jnp.allclose(jnp.sum(out1, axis=0), jnp.ones((256,)), atol=1e-5)

    # Case 2: explicit col_tile with D not a multiple of the tile ->
    # exercises the tiled path with wrapper-side padding + slicing.
    x2 = jax.random.normal(k2, (8, 384), dtype=jnp.float32)
    out2 = jax.block_until_ready(my_softmax(x2, col_tile=256))
    ref2 = _reference(x2)
    assert out2.shape == x2.shape and out2.dtype == x2.dtype
    assert jnp.allclose(out2, ref2, atol=1e-6, rtol=1e-6)
    assert jnp.allclose(jnp.sum(out2, axis=0), jnp.ones((384,)), atol=1e-5)

    # Case 3: rank-3 input (like the torch module would accept) -> trailing
    # dims flattened into the lane axis, then restored.
    x3 = jax.random.normal(k3, (4, 6, 32), dtype=jnp.float32)
    out3 = jax.block_until_ready(my_softmax(x3))
    ref3 = _reference(x3)
    assert out3.shape == x3.shape and out3.dtype == x3.dtype
    assert jnp.allclose(out3, ref3, atol=1e-6, rtol=1e-6)
    assert jnp.allclose(jnp.sum(out3, axis=0), jnp.ones((6, 32)), atol=1e-5)

    print("KERNEL_OK")
</pallas_src>

<mosaic_0001>
module attributes {stable_mosaic.version = 11 : i64} {
  func.func @_softmax_dim0_kernel(%arg0: i32, %arg1: memref<8x256xf32, #tpu.memory_space<vmem>>, %arg2: memref<8x256xf32, #tpu.memory_space<vmem>>) attributes {dimension_semantics = [#tpu.dimension_semantics<parallel>], iteration_bounds = array<i64: 1>, scalar_prefetch = 0 : i64, scratch_operands = 0 : i64, tpu.core_type = #tpu.core_type<tc>, window_params = [{pipeline_mode = #tpu.pipeline_mode<synchronous>, transform_indices = @transform_0, window_bounds = array<i64: 8, 256>}, {pipeline_mode = #tpu.pipeline_mode<synchronous>, transform_indices = @transform_1, window_bounds = array<i64: 8, 256>}]} {
    %c0 = arith.constant 0 : index
    %c0_0 = arith.constant 0 : index
    %0 = vector.load %arg1[%c0, %c0_0] : memref<8x256xf32, #tpu.memory_space<vmem>>, vector<8x256xf32>
    %1 = math.exp %0 : vector<8x256xf32>
    %cst = arith.constant dense<0.000000e+00> : vector<256xf32>
    %2 = vector.multi_reduction <add>, %1, %cst [0] : vector<8x256xf32> to vector<256xf32>
    %3 = vector.shape_cast %2 : vector<256xf32> to vector<1x256xf32>
    %4 = tpu.reciprocal %3 : vector<1x256xf32> -> vector<1x256xf32>
    %5 = vector.broadcast %4 : vector<1x256xf32> to vector<8x256xf32>
    %6 = arith.mulf %1, %5 : vector<8x256xf32>
    %c0_1 = arith.constant 0 : index
    %c0_2 = arith.constant 0 : index
    %7 = vector.load %arg2[%c0_1, %c0_2] : memref<8x256xf32, #tpu.memory_space<vmem>>, vector<8x256xf32>
    tpu.vector_store %arg2[%c0_1, %c0_2], %6 {strides = array<i32>} : memref<8x256xf32, #tpu.memory_space<vmem>>, vector<8x256xf32>,
    return
  }
  func.func @transform_0(%arg0: i32) -> (i32, i32) {
    %c0_i32 = arith.constant 0 : i32
    %c0_i32_0 = arith.constant 0 : i32
    %c0_i32_1 = arith.constant 0 : i32
    return %c0_i32, %c0_i32_0 : i32, i32
  }
  func.func @transform_1(%arg0: i32) -> (i32, i32) {
    %c0_i32 = arith.constant 0 : i32
    %c0_i32_0 = arith.constant 0 : i32
    %c0_i32_1 = arith.constant 0 : i32
    return %c0_i32, %c0_i32_0 : i32, i32
  }
}

</mosaic_0001>

<bundles_post_ra>
// kernel: tpu_custom_call.1
= control target key start
LH: loop header
LB: loop body
LE: loop exit
PB: predicated region body
PF: predicated region fallthrough
CT: control target
= control target key end

     0   :  { %6 = vsyncpa [#allocation3], 0  ;;  %s170_s0 = inlined_call_operand.hbm [shape: f32[8,256], index: 0, kind: input, shape index: {}]   ;;  %s171_s1 = inlined_call_operand.hbm [shape: f32[8,256], index: 1, kind: output, shape index: {}]  }
   0x1   :  { %7 = vsyncpa [#allocation4], 0  ;;  %s13_s8 = sshll.u32 %s170_s0, 4  ;;  %s152_s9 = smov [#allocation2]   ;;  %s14_s8 = int_to_ptr.hbm [resolvable:$true] %s13_s8 }
   0x2   :  { %s15_s10 = sshll.u32 %s152_s9, 4  ;;  %s16_s10 = int_to_ptr.vmem [resolvable:$true] %s15_s10 }
   0x3   :  { %18 = dma.hbm_to_vmem [thread:$0]  %s14_s8, 256, %s16_s10, [#allocation3]  }
   0x4   :  { %148 = dma.done.wait [#allocation3], 256  }
   0x5   :  { %149 = vsyncadd [#allocation3], 4294967040  ;;  %v23_v0 = vld [vmem:[#allocation2] sm:$0xff]  ;;  %v24_v1 = vld [vmem:[#allocation2 + $0x8] sm:$0xff]  ;;  %s153_s0 = smov [#allocation5]   ;;  %s80_s14 = sshll.u32 %s171_s1, 4  ;;  %s81_s14 = int_to_ptr.hbm [resolvable:$true] %s80_s14 }
   0x6   :  { %v25_v2 = vmul.f32 1.442695, %v23_v0  ;;  %v27_v3 = vmul.f32 1.442695, %v24_v1  ;;  %s78_s11 = sshll.u32 %s153_s0, 4  ;;  %s79_s11 = int_to_ptr.vmem [resolvable:$true] %s78_s11 }
   0x8   :  { %92 = vpow2.f32 %v25_v2 }
   0x9   :  { %94 = vpow2.f32 %v27_v3 }
   0xe   :  { %v93_v4 = vpop.eup %92 }
   0xf   :  { %v95_v5 = vpop.eup %94  ;;  %v29_v6 = vrot.slane %v93_v4, 4 }
  0x10   :  { %v35_v7 = vrot.slane %v95_v5, 4 }
  0x11   :  { %v30_v8 = vadd.f32 %v93_v4, %v29_v6 }
  0x12   :  { %v36_v9 = vadd.f32 %v95_v5, %v35_v7 }
  0x13   :  { %v31_v10 = vrot.slane %v30_v8, 2 }
  0x14   :  { %v37_v11 = vrot.slane %v36_v9, 2 }
  0x15   :  { %v32_v12 = vadd.f32 %v31_v10, %v30_v8 }
  0x16   :  { %v38_v13 = vadd.f32 %v37_v11, %v36_v9 }
  0x17   :  { %v33_v14 = vrot.slane %v32_v12, 1 }
  0x18   :  { %v39_v15 = vrot.slane %v38_v13, 1 }
  0x19   :  { %v34_v16 = vadd.f32 %v33_v14, %v32_v12 }
  0x1a   :  { %v40_v17 = vadd.f32 %v39_v15, %v38_v13 }
  0x1b   :  { %96 = vrcp.f32 %v34_v16  ;;  %vm46_vm0 = vweird.f32 %v34_v16  ;;  %v52_v21 = vand.u32 2147483648, %v34_v16  ;;  %v50_v24 = vand.u32 2147483647, %v34_v16 }
  0x1c   :  { %98 = vrcp.f32 %v40_v17  ;;  %v66_v25 = vand.u32 2147483648, %v40_v17  ;;  %vm60_vm2 = vweird.f32 %v40_v17  ;;  %v64_v27 = vand.u32 2147483647, %v40_v17 }
  0x1d   :  { %v53_v29 = vor.u32 1.1754944e-38, %v52_v21  ;;  %vm51_vm5 = vcmp.eq.f32.partialorder %v50_v24, 8.507059e+37 }
  0x1e   :  { %v67_v32 = vor.u32 1.1754944e-38, %v66_v25  ;;  %vm65_vm7 = vcmp.eq.f32.partialorder %v64_v27, 8.507059e+37 }
  0x21   :  { %v97_v18 = vpop.eup %96 }
  0x22   :  { %v99_v19 = vpop.eup %98  ;;  %v42_v20 = vmul.f32 %v97_v18, %v34_v16  ;;  %vm47_vm1 = vweird.f32 %v97_v18 }
  0x23   :  { %v56_v22 = vmul.f32 %v99_v19, %v40_v17  ;;  %vm61_vm3 = vweird.f32 %v99_v19  ;;  %vm48_vm4 = vmor %vm46_vm0, %vm47_vm1 }
  0x24   :  { %v43_v23 = vsub.f32 1.0, %v42_v20  ;;  %vm62_vm6 = vmor %vm60_vm2, %vm61_vm3 }
  0x25   :  { %v57_v26 = vsub.f32 1.0, %v56_v22 }
  0x26   :  { %v44_v28 = vmul.f32 %v97_v18, %v43_v23 }
  0x27   :  { %v58_v30 = vmul.f32 %v99_v19, %v57_v26 }
  0x28   :  { %v45_v31 = vadd.f32 %v97_v18, %v44_v28 }
  0x29   :  { %v59_v33 = vadd.f32 %v99_v19, %v58_v30 }
  0x2a   :  { %v49_v34 = vsel %vm48_vm4, %v97_v18, %v45_v31 }
  0x2b   :  { %v54_v35 = vsel %vm51_vm5, %v53_v29, %v49_v34  ;;  %v63_v36 = vsel %vm62_vm6, %v99_v19, %v59_v33 }
  0x2c   :  { %v69_v37 = vmul.f32 %v93_v4, %v54_v35  ;;  %v68_v38 = vsel %vm65_vm7, %v67_v32, %v63_v36 }
  0x2d   :  { %v70_v39 = vmul.f32 %v95_v5, %v68_v38 }
  0x2e   :  { %71 = vst [vmem:[#allocation5] sm:$0xff] %v69_v37 }
  0x2f   :  { %72 = vst [vmem:[#allocation5 + $0x8] sm:$0xff] %v70_v39 }
  0x30   :  { %83 = dma.vmem_to_hbm [thread:$0]  %s79_s11, 256, %s81_s14, [#allocation4]  }
  0x31   :  { %150 = dma.done.wait [#allocation4], 256  }
  0x32   :  { %151 = vsyncadd [#allocation4], 4294967040 }
  0x33   :  { %88 = vsyncpa [#allocation3], 1 }
  0x34   :  { %89 = vsyncpa [#allocation4], 1 }

</bundles_post_ra>
